<compile_context>
chip_gen: v7x
topology: tpu7x:2x2x1
jax: 0.10.0
libtpu: 0.0.40
codegen_flags: <defaults>
</compile_context>

<pallas_src>
import math

import jax
import jax.numpy as jnp
from jax.experimental import pallas as pl
from jax.experimental.pallas import tpu as pltpu

_SQRT_2_OVER_PI = math.sqrt(2.0 / math.pi)
_GELU_COEFF = 0.044715

_LANE = 128
_TARGET_BLOCK_BYTES = 1 << 20  # ~1 MiB per block (past the HBM-roofline knee)


def _gelu_kernel(x_ref, o_ref):
    x = x_ref[...].astype(jnp.float32)
    # 0.5 * x * (1 + tanh(sqrt(2/pi) * (x + 0.044715 * x^3)))
    x2 = x * x
    inner = _SQRT_2_OVER_PI * x * (1.0 + _GELU_COEFF * x2)
    o_ref[...] = (0.5 * x * (1.0 + jnp.tanh(inner))).astype(o_ref.dtype)


def _sublane_min(dtype) -> int:
    # f32 -> 8, bf16/f16 -> 16, int8/fp8 -> 32
    itemsize = jnp.dtype(dtype).itemsize
    return max(8, 32 // max(1, itemsize))


def gelu(x: jax.Array) -> jax.Array:
    """Tanh-approx GELU matching the PyTorch module exactly."""
    orig_shape = x.shape
    dtype = x.dtype
    n = int(math.prod(orig_shape)) if orig_shape else 1

    sub = _sublane_min(dtype)
    itemsize = jnp.dtype(dtype).itemsize
    chunk = sub * _LANE

    flat = x.reshape(-1)
    n_pad = -(-n // chunk) * chunk
    was_padded = n_pad != n
    if was_padded:
        # Only the ragged tail is padded (single pad, no scatter / full copy).
        flat = jnp.pad(flat, (0, n_pad - n))

    rows = n_pad // _LANE  # multiple of `sub`
    x2d = flat.reshape(rows, _LANE)

    # ~1 MiB target blocks, rounded to the dtype sublane minimum.
    target_rows = max(sub, ((_TARGET_BLOCK_BYTES // (_LANE * itemsize)) // sub) * sub)

    num_blocks = max(1, pl.cdiv(rows, target_rows))
    if num_blocks == 1 and rows > sub:
        # Small input: keep >= 2 grid steps so v7x can use both TensorCores.
        num_blocks = 2
    # Split rows evenly across blocks (avoids a tiny ragged last block),
    # keeping the tile a multiple of the sublane minimum.
    row_tile = -(-(-(-rows // num_blocks)) // sub) * sub
    row_tile = min(rows, max(sub, row_tile))

    grid = (pl.cdiv(rows, row_tile),)

    out2d = pl.pallas_call(
        _gelu_kernel,
        out_shape=jax.ShapeDtypeStruct((rows, _LANE), dtype),
        grid=grid,
        in_specs=[pl.BlockSpec((row_tile, _LANE), lambda i: (i, 0))],
        out_specs=pl.BlockSpec((row_tile, _LANE), lambda i: (i, 0)),
        compiler_params=pltpu.CompilerParams(
            dimension_semantics=("parallel",)
        ),
    )(x2d)

    out_flat = out2d.reshape(-1)
    if was_padded:
        out_flat = out_flat[:n]
    return out_flat.reshape(orig_shape)


if __name__ == "__main__":
    key = jax.random.PRNGKey(0)
    # Example input consistent with an NCHW activation tensor.
    x = jax.random.normal(key, (2, 4, 16, 16), dtype=jnp.float32)

    out = gelu(x)
    jax.block_until_ready(out)

    # Reference check in plain JAX (same tanh-approx formula).
    ref = 0.5 * x * (1.0 + jnp.tanh(_SQRT_2_OVER_PI * (x + _GELU_COEFF * x ** 3)))
    assert out.shape == x.shape and out.dtype == x.dtype
    assert jnp.max(jnp.abs(out - ref)) < 1e-5

    print("KERNEL_OK")
</pallas_src>

<mosaic_0001>
module attributes {stable_mosaic.version = 11 : i64} {
  func.func @_gelu_kernel(%arg0: i32, %arg1: memref<8x128xf32, #tpu.memory_space<vmem>>, %arg2: memref<8x128xf32, #tpu.memory_space<vmem>>) attributes {dimension_semantics = [#tpu.dimension_semantics<parallel>], iteration_bounds = array<i64: 2>, scalar_prefetch = 0 : i64, scratch_operands = 0 : i64, tpu.core_type = #tpu.core_type<tc>, window_params = [{transform_indices = @transform_0, window_bounds = array<i64: 8, 128>}, {transform_indices = @transform_1, window_bounds = array<i64: 8, 128>}]} {
    %c0 = arith.constant 0 : index
    %c0_0 = arith.constant 0 : index
    %0 = vector.load %arg1[%c0, %c0_0] : memref<8x128xf32, #tpu.memory_space<vmem>>, vector<8x128xf32>
    %1 = arith.mulf %0, %0 : vector<8x128xf32>
    %cst = arith.constant 0.797884583 : f32
    %2 = vector.broadcast %cst : f32 to vector<8x128xf32>
    %3 = arith.mulf %2, %0 : vector<8x128xf32>
    %cst_1 = arith.constant 4.471500e-02 : f32
    %4 = vector.broadcast %cst_1 : f32 to vector<8x128xf32>
    %5 = arith.mulf %4, %1 : vector<8x128xf32>
    %cst_2 = arith.constant 1.000000e+00 : f32
    %6 = vector.broadcast %cst_2 : f32 to vector<8x128xf32>
    %7 = arith.addf %6, %5 : vector<8x128xf32>
    %8 = arith.mulf %3, %7 : vector<8x128xf32>
    %cst_3 = arith.constant 5.000000e-01 : f32
    %9 = vector.broadcast %cst_3 : f32 to vector<8x128xf32>
    %10 = arith.mulf %9, %0 : vector<8x128xf32>
    %11 = math.tanh %8 : vector<8x128xf32>
    %cst_4 = arith.constant 1.000000e+00 : f32
    %12 = vector.broadcast %cst_4 : f32 to vector<8x128xf32>
    %13 = arith.addf %12, %11 : vector<8x128xf32>
    %14 = arith.mulf %10, %13 : vector<8x128xf32>
    %c0_5 = arith.constant 0 : index
    %c0_6 = arith.constant 0 : index
    %15 = vector.load %arg2[%c0_5, %c0_6] : memref<8x128xf32, #tpu.memory_space<vmem>>, vector<8x128xf32>
    tpu.vector_store %arg2[%c0_5, %c0_6], %14 {strides = array<i32>} : memref<8x128xf32, #tpu.memory_space<vmem>>, vector<8x128xf32>,
    return
  }
  func.func @transform_0(%arg0: i32) -> (i32, i32) {
    %c0_i32 = arith.constant 0 : i32
    %c0_i32_0 = arith.constant 0 : i32
    return %arg0, %c0_i32 : i32, i32
  }
  func.func @transform_1(%arg0: i32) -> (i32, i32) {
    %c0_i32 = arith.constant 0 : i32
    %c0_i32_0 = arith.constant 0 : i32
    return %arg0, %c0_i32 : i32, i32
  }
}

</mosaic_0001>

<bundles_post_ra>
// kernel: tpu_custom_call.1
= control target key start
LH: loop header
LB: loop body
LE: loop exit
PB: predicated region body
PF: predicated region fallthrough
CT: control target
= control target key end

     0   :  { %6 = vsyncpa [#allocation3], 0  ;;  %s558_s0 = inlined_call_operand.hbm [shape: f32[16,128], index: 0, kind: input, shape index: {}]   ;;  %s559_s1 = inlined_call_operand.hbm [shape: f32[16,128], index: 1, kind: output, shape index: {}]  }
   0x1   :  { %8 = vsyncpa [#allocation3 + $0x1], 0 }
   0x2   :  { %9 = vsyncpa [#allocation4], 0 }
   0x3   :  { %11 = vsyncpa [#allocation4 + $0x1], 0  ;;  %s397_s6 = smov 0   ;;  %s399_s7 = smov 0  }
   0x4   :  { %s401_s8 = smov 0   ;;  %s403_s9 = smov 0  }
   0x5 LB: > { %s418_s10 = sadd.s32 4294967295, %s383_s9   ;;  %s227_s11 = sadd.s32 4294967294, %s383_s9   ;;  %s383_s9 = sphi %s403_s9, %s574_s9   ;;  %s379_s8 = sphi %s401_s8, %s573_s8   ;;  %s375_s7 = sphi %s399_s7, %s572_s7   ;;  %s371_s6 = sphi %s397_s6, %s571_s6  }
   0x6   : > { %s422_s12 = sadd.s32 1, %s383_s9   ;;  %s24_s13 = sadd.s32 1, %s379_s8 }
   0x7   : > { %s21_s14 = ssub.s32 %s383_s9, %s422_s12  ;;  %p31_p0 = scmp.ne.s32.totalorder %s379_s8, %s375_s7 }
   0x8   : > { %p22_p1 = scmp.eq.s32.totalorder %s21_s14, 0  ;;  %p32_p2 = scmp.eq.s32.totalorder %s383_s9, 0 }
   0x9   : > { %p37_p3 = scmp.ne.s32.totalorder %s375_s7, %s371_s6  ;;  %p38_p4 = scmp.eq.s32.totalorder %s418_s10, 0 }
   0xa   : > { %s434_s15 = scalar_select %p22_p1, %s379_s8, %s24_s13  }
   0xb   : > { %p436_p5 = por %p32_p2, %p31_p0  ;;  %p440_p6 = por %p38_p4, %p37_p3 }
   0xc   : > { %p61_p7 = scmp.eq.s32.totalorder %s418_s10, 1  ;;  %p67_p8 = scmp.eq.s32.totalorder %s227_s11, 1 }
   0xd   : > { %p251_p10 = scmp.lt.s32.totalorder %s383_s9, 2  ;;  %s87_s20 = sand.u32 1, %s379_s8  }
   0xe   : > { %p447_p11 = por %p61_p7, %p31_p0  ;;  %p451_p12 = por %p67_p8, %p37_p3 }
   0xf   : > { %s231_s21 = sshll.u32 %s383_s9, 7  ;;  %s230_s22 = sshll.u32 %s87_s20, 3 }
  0x10   : > { %s563_s18 = scalar_select %p447_p11, 1, 0 }
  0x11   : > { %s564_s19 = scalar_select %p451_p12, 1, 0 }
  0x12   : > { %s460_s25 = scalar_lea.hbm %s558_s0, %s231_s21  ;;  %s91_s26 = scalar_lea.vmem [#allocation2], %s230_s22 }
  0x13   : > { %s98_s27 = sshll.u32 %s91_s26, 4  ;;  %p464_p13 = pnand %p251_p10, %p436_p5  ;;  %s468_s27 = int_to_ptr.vmem [resolvable:$true] %s98_s27 }
  0x14   : > { %s88_s29 = scalar_lea.sflag [#allocation3], %s87_s20  ;;  %s287_s30 = scalar_lea.hbm %s460_s25, 128 }
  0x15   : > { %p288_p2 = scmp.ne.s32.totalorder %s460_s25, %s287_s30  ;;  %p289_p3 = pneg %p464_p13 }
  0x16   : > { %s292_s4 = scalar_lea.hbm %s558_s0, 256  ;;  %p293_p5 = scmp.lt.u32.totalorder %s460_s25, %s558_s0 }
  0x17   : > { %p290_p4 = pnand %p289_p3, %p288_p2  ;;  %p294_p8 = scmp.lt.u32.totalorder %s292_s4, %s287_s30 }
  0x18   : > { %p296_p9 = scmp.lt.u32.totalorder %s287_s30, %s460_s25 }
  0x19   : > { %p291_p7 = pneg %p290_p4  ;;  %p295_p10 = por %p294_p8, %p293_p5 }
  0x1b   : > { %p297_p0 = por %p296_p9, %p295_p10 }
  0x1d   : > { %p298_p1 = pnand %p297_p0, %p291_p7 }
  0x1f   : > { %301 = shalt.err (!%p298_p1)
}
  0x20   : > { %s302_s13 = scalar_lea.vmem %s468_s27, 128  ;;  %s385_s14 = smov [#allocation2]  }
  0x21   : > { %p303_p2 = scmp.ne.s32.totalorder %s468_s27, %s302_s13  ;;  %s307_s16 = sshll.u32 %s385_s14, 4  ;;  %s308_s16 = int_to_ptr.vmem [resolvable:$false] %s307_s16 }
  0x22   : > { %s309_s20 = scalar_lea.vmem %s308_s16, 256  ;;  %p310_p11 = scmp.lt.s32.totalorder %s468_s27, %s308_s16 }
  0x23   : > { %p305_p4 = pnand %p303_p2, %p289_p3  ;;  %p311_p5 = scmp.lt.s32.totalorder %s309_s20, %s302_s13 }
  0x25   : > { %p306_p12 = pneg %p305_p4  ;;  %p312_p8 = por %p311_p5, %p310_p11 }
  0x27   : > { %p313_p9 = pnand %p312_p8, %p306_p12 }
  0x29   : > { %316 = shalt.err (!%p313_p9)
}
  0x2a   : > { %246 = dma.hbm_to_vmem [thread:$0]  (!%p464_p13), %s460_s25, 128, %s468_s27, %s88_s29  }
  0x2b   : > { %p566_p0 = scmp.lt.s32.totalorder %s383_s9, 3  ;;  %p567_p1 = scmp.ge.s32.totalorder %s383_s9, 1 }
  0x2d   : > { %p104_p3 = pnand %p567_p1, %p566_p0 }
  0x2e   : > { %s502_s21 = sand.u32 (!%p104_p3), 1, %s375_s7  }
  0x2f   : > { %107 = sbr.rel (%p104_p3) target bundleno = 93 (0x5d), region = 24  ;;  %s233_s22 = sshll.u32 (!%p104_p3), %s502_s21, 3 }
  0x30   : > { %s110_s23 = scalar_lea.sflag (!%p104_p3), [#allocation3], %s502_s21  ;;  %s113_s24 = scalar_lea.vmem (!%p104_p3), [#allocation2], %s233_s22 }
  0x36   : > { %362 = dma.done.wait (%p440_p6), %s110_s23, 128  }
  0x37   : > { %364 = vsyncadd (%p440_p6), %s110_s23, 4294967168  ;;  %v132_v0 = vld [vmem:[%s113_s24] sm:$0xff]  ;;  %s131_s25 = scalar_lea.vmem [#allocation5], %s233_s22  ;;  %s236_s27 = sshll.u32 %s418_s10, 7 }
  0x38   : > { %v133_v1 = vmul.f32 %v132_v0, %v132_v0  ;;  %v134_v2 = vmul.f32 0.7978846, %v132_v0  ;;  %v138_v6 = vmul.f32 0.5, %v132_v0  ;;  %s157_s26 = sshll.u32 %s131_s25, 4  ;;  %s516_s29 = scalar_lea.hbm %s559_s1, %s236_s27  ;;  %s511_s26 = int_to_ptr.vmem [resolvable:$true] %s157_s26 }
  0x39   : > { %s144_s30 = scalar_lea.sflag [#allocation4], %s502_s21  ;;  %s317_s2 = scalar_lea.vmem %s511_s26, 128 }
  0x3a   : > { %v135_v3 = vmul.f32 0.044715, %v133_v1  ;;  %p318_p6 = scmp.ne.s32.totalorder %s511_s26, %s317_s2  ;;  %p568_p11 = scmp.ne.s32.totalorder %s563_s18, 0 }
  0x3b   : > { %s386_s10 = smov [#allocation5]  }
  0x3c   : > { %v136_v4 = vadd.f32 1.0, %v135_v3  ;;  %p319_p12 = pnand %p318_p6, %p568_p11  ;;  %s321_s3 = sshll.u32 %s386_s10, 4  ;;  %s322_s3 = int_to_ptr.vmem [resolvable:$false] %s321_s3 }
  0x3d   : > { %s323_s4 = scalar_lea.vmem %s322_s3, 256  ;;  %p324_p7 = scmp.lt.s32.totalorder %s511_s26, %s322_s3 }
  0x3e   : > { %v137_v5 = vmul.f32 %v136_v4, %v134_v2  ;;  %p320_p13 = pneg %p319_p12  ;;  %p325_p10 = scmp.lt.s32.totalorder %s323_s4, %s317_s2 }
  0x40   : > { %285 = vtanh.f32 %v137_v5  ;;  %p326_p2 = por %p325_p10, %p324_p7 }
  0x42   : > { %p327_p4 = pnand %p326_p2, %p320_p13 }
  0x4a   : > { %v286_v7 = vpop.eup %285 }
  0x4b   : > { %v140_v8 = vadd.f32 1.0, %v286_v7 }
  0x4d   : > { %v141_v9 = vmul.f32 %v140_v8, %v138_v6 }
  0x4f   : > { %142 = vst [vmem:[%s131_s25] sm:$0xff] %v141_v9 }
  0x50   : > { %330 = shalt.err (!%p327_p4)
}
  0x51   : > { %s331_s5 = scalar_lea.hbm %s516_s29, 128  ;;  %s335_s14 = scalar_lea.hbm %s559_s1, 256 }
  0x52   : > { %p332_p5 = scmp.ne.s32.totalorder %s516_s29, %s331_s5  ;;  %p336_p0 = scmp.lt.u32.totalorder %s516_s29, %s559_s1 }
  0x53   : > { %p337_p1 = scmp.lt.u32.totalorder %s335_s14, %s331_s5  ;;  %p339_p6 = scmp.lt.u32.totalorder %s331_s5, %s516_s29 }
  0x54   : > { %p333_p8 = pnand %p332_p5, %p568_p11 }
  0x55   : > { %p338_p3 = por %p337_p1, %p336_p0 }
  0x56   : > { %p334_p9 = pneg %p333_p8 }
  0x57   : > { %p340_p12 = por %p339_p6, %p338_p3 }
  0x59   : > { %p341_p13 = pnand %p340_p12, %p334_p9 }
  0x5b   : > { %344 = shalt.err (!%p341_p13)
}
  0x5c   : > { %241 = dma.vmem_to_hbm [thread:$0]  (%p568_p11), %s511_s26, 128, %s516_s29, %s144_s30  }
  0x5d PF: > { %s169_s21 = sand.u32 1, %s371_s6   ;;  %p569_p7 = scmp.ne.s32.totalorder %s564_s19, 0 }
  0x5e   : > { %p570_p10 = scmp.ge.s32.totalorder %s383_s9, 2  ;;  %s170_s22 = scalar_lea.sflag [#allocation4], %s169_s21 }
  0x60   : > { %p248_p2 = pnand %p570_p10, %p569_p7 }
  0x62   : > { %366 = dma.done.wait (!%p248_p2), %s170_s22, 128  }
  0x63   : > { %368 = vsyncadd (!%p248_p2), %s170_s22, 4294967168  ;;  %p14_p4 = scmp.ge.s32.totalorder %s422_s12, 4   ;;  %s571_s6 = smov %s375_s7 }
  0x64   : > { %s572_s7 = smov %s379_s8  ;;  %s573_s8 = smov %s434_s15 }
  0x65   : > { %s574_s9 = smov %s422_s12  ;;  %16 = sbr.rel (!%p14_p4) target bundleno = 5 (0x5), region = 69 }
  0x6c   :  { %175 = vsyncpa [#allocation3], 1 }
  0x6d   :  { %177 = vsyncpa [#allocation3 + $0x1], 1 }
  0x6e   :  { %178 = vsyncpa [#allocation4], 1 }
  0x6f   :  { %180 = vsyncpa [#allocation4 + $0x1], 1 }

</bundles_post_ra>
